<compile_context>
chip_gen: v7x
topology: tpu7x:2x2x1
jax: 0.10.0
libtpu: 0.0.40
codegen_flags: <defaults>
</compile_context>

<pallas_src>
import jax
import jax.numpy as jnp
from jax.experimental import pallas as pl
from jax.experimental.pallas import tpu as pltpu


def _fused_conv_gemm_kernel(p_ref, w_ref, b_ref, o_ref):
    # p_ref: (M_blk, Kp)  lane-dense im2col patch rows
    # w_ref: (Kp, Cout)   folded conv weights (layer_2 scalar already applied)
    # b_ref: (1, Cout)    folded bias
    # o_ref: (M_blk, Cout)
    acc = jnp.dot(p_ref[...], w_ref[...], preferred_element_type=jnp.float32)
    o_ref[...] = jnp.maximum(acc + b_ref[...], 0.0)


def model_forward(z, w1, b1, w2_scalar):
    """z: (N, Cin, D, H, W) f32 -> (N, Cout, D-2, H-2, W-2) f32 (NCDHW)."""
    N, Cin, D, H, W = z.shape
    Cout = w1.shape[0]
    Do, Ho, Wo = D - 2, H - 2, W - 2
    K = 27 * Cin
    Kp = max(128, ((K + 127) // 128) * 128)          # lane-dense contraction dim
    M_total = N * Do * Ho * Wo

    # ---- fold layer_2 (1x1x1 scalar conv + ReLU) into layer_1 ----
    s = jnp.maximum(w2_scalar.astype(jnp.float32), 0.0)
    w1f = w1.astype(jnp.float32) * s
    b1f = b1.astype(jnp.float32) * s

    # ---- wrapper-side im2col: tiny at these shapes, makes the kernel one GEMM ----
    zl = jnp.transpose(z, (0, 2, 3, 4, 1))            # (N, D, H, W, Cin)
    taps = []
    for kd in range(3):
        for kh in range(3):
            for kw in range(3):
                taps.append(zl[:, kd:kd + Do, kh:kh + Ho, kw:kw + Wo, :])
    patches = jnp.stack(taps, axis=4)                 # (N, Do, Ho, Wo, 27, Cin)
    patches = patches.reshape(M_total, K)
    patches = jnp.pad(patches, ((0, 0), (0, Kp - K))) # (M_total, Kp), zero-padded K

    # weights as (Kp, Cout), tap-major (kd, kh, kw, cin); zero-padded K rows
    w_mat = jnp.transpose(w1f, (2, 3, 4, 1, 0)).reshape(K, Cout)
    w_mat = jnp.pad(w_mat, ((0, Kp - K), (0, 0)))
    b_row = b1f.reshape(1, Cout)

    # Split M into 2 parallel blocks (feeds both v7x TCs) when sublane-aligned.
    G = 2 if (M_total % 16 == 0) else 1
    M_blk = M_total // G

    out_flat = pl.pallas_call(
        _fused_conv_gemm_kernel,
        out_shape=jax.ShapeDtypeStruct((M_total, Cout), jnp.float32),
        grid=(G,),
        in_specs=[
            pl.BlockSpec((M_blk, Kp), lambda i: (i, 0)),
            pl.BlockSpec((Kp, Cout), lambda i: (0, 0)),
            pl.BlockSpec((1, Cout), lambda i: (0, 0)),
        ],
        out_specs=pl.BlockSpec((M_blk, Cout), lambda i: (i, 0)),
        compiler_params=pltpu.CompilerParams(
            dimension_semantics=("parallel",)),
        cost_estimate=pl.CostEstimate(
            flops=2 * M_total * Kp * Cout,
            transcendentals=0,
            bytes_accessed=4 * (M_total * Kp + Kp * Cout + Cout
                                + M_total * Cout)),
    )(patches, w_mat, b_row)

    # Restore PyTorch's NCDHW output layout (single small XLA transpose).
    out = out_flat.reshape(N, Do, Ho, Wo, Cout)
    return jnp.transpose(out, (0, 4, 1, 2, 3))


if __name__ == "__main__":
    key = jax.random.PRNGKey(0)
    k_z, k_w1, k_b1, k_w2 = jax.random.split(key, 4)

    N, Cin, D, H, W = 2, 3, 8, 8, 8
    Cout = 64

    z = jax.random.normal(k_z, (N, Cin, D, H, W), dtype=jnp.float32)
    w1 = jax.random.normal(k_w1, (Cout, Cin, 3, 3, 3), dtype=jnp.float32) * 0.1
    b1 = jax.random.normal(k_b1, (Cout,), dtype=jnp.float32) * 0.1
    w2 = jax.random.normal(k_w2, (), dtype=jnp.float32)   # Conv3d(1,1,1x1x1) weight

    fwd = jax.jit(model_forward)

    # Check both signs of the layer_2 scalar (positive scale path and the
    # ReLU-clamps-to-zero path).
    for w2_test in (jnp.abs(w2) + 0.1, -(jnp.abs(w2) + 0.1)):
        out = jax.block_until_ready(fwd(z, w1, b1, w2_test))

        # Reference: XLA conv for layer_1, scalar 1x1x1 conv + ReLU for layer_2.
        ref_v1 = jax.lax.conv_general_dilated(
            z, w1, window_strides=(1, 1, 1), padding="VALID",
            dimension_numbers=("NCDHW", "OIDHW", "NCDHW"))
        ref_v1 = jnp.maximum(ref_v1 + b1.reshape(1, Cout, 1, 1, 1), 0.0)
        ref = jnp.maximum(ref_v1 * w2_test, 0.0)

        assert out.shape == (N, Cout, D - 2, H - 2, W - 2), out.shape
        err = float(jnp.max(jnp.abs(out - ref)))
        assert jnp.allclose(out, ref, atol=1e-4, rtol=1e-4), err

    print("KERNEL_OK")
</pallas_src>

<mosaic_0001>
module attributes {stable_mosaic.version = 11 : i64} {
  func.func @_fused_conv_gemm_kernel(%arg0: i32, %arg1: memref<216x128xf32, #tpu.memory_space<vmem>>, %arg2: memref<128x64xf32, #tpu.memory_space<vmem>>, %arg3: memref<1x64xf32, #tpu.memory_space<vmem>>, %arg4: memref<216x64xf32, #tpu.memory_space<vmem>>) attributes {dimension_semantics = [#tpu.dimension_semantics<parallel>], iteration_bounds = array<i64: 2>, scalar_prefetch = 0 : i64, scratch_operands = 0 : i64, tpu.core_type = #tpu.core_type<tc>, window_params = [{transform_indices = @transform_0, window_bounds = array<i64: 216, 128>}, {pipeline_mode = #tpu.pipeline_mode<synchronous>, transform_indices = @transform_1, window_bounds = array<i64: 128, 64>}, {pipeline_mode = #tpu.pipeline_mode<synchronous>, transform_indices = @transform_2, window_bounds = array<i64: 1, 64>}, {transform_indices = @transform_3, window_bounds = array<i64: 216, 64>}]} {
    %c0 = arith.constant 0 : index
    %c0_0 = arith.constant 0 : index
    %0 = vector.load %arg1[%c0, %c0_0] : memref<216x128xf32, #tpu.memory_space<vmem>>, vector<216x128xf32>
    %c0_1 = arith.constant 0 : index
    %c0_2 = arith.constant 0 : index
    %1 = vector.load %arg2[%c0_1, %c0_2] : memref<128x64xf32, #tpu.memory_space<vmem>>, vector<128x64xf32>
    %cst = arith.constant dense<0.000000e+00> : vector<216x64xf32>
    %2 = tpu.matmul %0, %1, %cst {dimension_numbers = #tpu.dot_dimension_numbers<[1], [0], [0], [1], [0, 0, 1, 1], [], []>} : vector<216x128xf32>, vector<128x64xf32>, vector<216x64xf32> -> vector<216x64xf32>
    %c0_3 = arith.constant 0 : index
    %c0_4 = arith.constant 0 : index
    %3 = vector.load %arg3[%c0_3, %c0_4] : memref<1x64xf32, #tpu.memory_space<vmem>>, vector<1x64xf32>
    %4 = vector.broadcast %3 : vector<1x64xf32> to vector<216x64xf32>
    %5 = arith.addf %2, %4 : vector<216x64xf32>
    %cst_5 = arith.constant 0.000000e+00 : f32
    %6 = vector.broadcast %cst_5 : f32 to vector<216x64xf32>
    %7 = arith.maximumf %5, %6 : vector<216x64xf32>
    %c0_6 = arith.constant 0 : index
    %c0_7 = arith.constant 0 : index
    %8 = vector.load %arg4[%c0_6, %c0_7] : memref<216x64xf32, #tpu.memory_space<vmem>>, vector<216x64xf32>
    tpu.vector_store %arg4[%c0_6, %c0_7], %7 {strides = array<i32>} : memref<216x64xf32, #tpu.memory_space<vmem>>, vector<216x64xf32>,
    return
  }
  func.func @transform_0(%arg0: i32) -> (i32, i32) {
    %c0_i32 = arith.constant 0 : i32
    %c0_i32_0 = arith.constant 0 : i32
    return %arg0, %c0_i32 : i32, i32
  }
  func.func @transform_1(%arg0: i32) -> (i32, i32) {
    %c0_i32 = arith.constant 0 : i32
    %c0_i32_0 = arith.constant 0 : i32
    %c0_i32_1 = arith.constant 0 : i32
    return %c0_i32, %c0_i32_0 : i32, i32
  }
  func.func @transform_2(%arg0: i32) -> (i32, i32) {
    %c0_i32 = arith.constant 0 : i32
    %c0_i32_0 = arith.constant 0 : i32
    %c0_i32_1 = arith.constant 0 : i32
    return %c0_i32, %c0_i32_0 : i32, i32
  }
  func.func @transform_3(%arg0: i32) -> (i32, i32) {
    %c0_i32 = arith.constant 0 : i32
    %c0_i32_0 = arith.constant 0 : i32
    return %arg0, %c0_i32 : i32, i32
  }
}

</mosaic_0001>

<bundles_post_ra>
// kernel: model_forward.1
= control target key start
LH: loop header
LB: loop body
LE: loop exit
PB: predicated region body
PF: predicated region fallthrough
CT: control target
= control target key end

     0   :  { %s783_s12 = smov 0   ;;  %s1028_s0 = inlined_call_operand.vmem [shape: f32[432,128], index: 0, kind: input, shape index: {}]   ;;  %s1029_s1 = inlined_call_operand.vmem [shape: f32[128,64], index: 1, kind: input, shape index: {}]   ;;  %s1030_s2 = inlined_call_operand.vmem [shape: f32[1,64], index: 2, kind: input, shape index: {}]   ;;  %s1031_s3 = inlined_call_operand.vmem [shape: f32[432,64], index: 3, kind: output, shape index: {}]  }
   0x1 LB: > { %s535_s13 = sadd.s32 4294967295, %s758_s12   ;;  %p539_p0 = scmp.ge.s32.totalorder %s758_s12, 1  ;;  %s758_s12 = sphi %s783_s12, %s13_s12  }
   0x2   : > { %p138_p1 = scmp.lt.s32.totalorder %s758_s12, 3 }
   0x4   : > { %p139_p2 = pnand %p539_p0, %p138_p1 }
   0x5   : > { %v201_v0 = vld [vmem:[%s1029_s1] sm:$0xff] (!%p139_p2)  ;;  %v202_v1 = vld [vmem:[%s1029_s1 + $0x8] sm:$0xff] (!%p139_p2)  ;;  %v203_v2 = vld [vmem:[%s1029_s1 + $0x10] sm:$0xff] (!%p139_p2)  ;;  %v760_v3 = vmov (!%p139_p2), 0.0|0.0   ;;  %vm761_vm0 = vmmov (!%p139_p2), 0   ;;  %v762_v6 = vmov (!%p139_p2), 0.0  }
   0x6   : > { %142 = sbr.rel (%p139_p2) target bundleno = 308 (0x134), region = 32  ;;  %701 = vmatprep.subr.bf16.mxu0 (!%p139_p2), %v760_v3  ;;  %v702_v4 = vpack.c.bf16 (!%p139_p2), %v202_v1, %v201_v0  ;;  %725 = vmatprep.subr.bf16.mxu1 (!%p139_p2), %v760_v3  ;;  %v204_v5 = vld [vmem:[%s1029_s1 + $0x18] sm:$0xff] (!%p139_p2)  ;;  %v205_v8 = vld [vmem:[%s1029_s1 + $0x20] sm:$0xff] (!%p139_p2)  ;;  %v206_v9 = vld [vmem:[%s1029_s1 + $0x28] sm:$0xff] (!%p139_p2)  ;;  %vm451_vm1 = vcmask (!%p139_p2), 523264  }
   0x7   : > { %620 = vmatprep.mubr.msk.f32.mxu0 (!%p139_p2), %vm761_vm0, %v762_v6  ;;  %662 = vmatprep.mubr.msk.f32.mxu1 (!%p139_p2), %vm761_vm0, %v762_v6  ;;  %v705_v7 = vpack.c.bf16 (!%p139_p2), %v204_v5, %v203_v2  ;;  %v708_v10 = vpack.c.bf16 (!%p139_p2), %v206_v9, %v205_v8  ;;  %v207_v11 = vld [vmem:[%s1029_s1 + $0x30] sm:$0xff] (!%p139_p2)  ;;  %v208_v12 = vld [vmem:[%s1029_s1 + $0x38] sm:$0xff] (!%p139_p2)  ;;  %v209_v14 = vld [vmem:[%s1029_s1 + $0x40] sm:$0xff] (!%p139_p2)  ;;  %s162_s7 = smul.u32 (!%p139_p2), 27, %s535_s13 }
   0x8   : > { %703 = vmatpush3.bf16.msra.mxu0 (!%p139_p2), %v702_v4  ;;  %733 = vmatpush3.bf16.msra.mxu1 (!%p139_p2), %v702_v4  ;;  %v711_v13 = vpack.c.bf16 (!%p139_p2), %v208_v12, %v207_v11  ;;  %v210_v15 = vld [vmem:[%s1029_s1 + $0x48] sm:$0xff] (!%p139_p2)  ;;  %v211_v17 = vld [vmem:[%s1029_s1 + $0x50] sm:$0xff] (!%p139_p2)  ;;  %v212_v18 = vld [vmem:[%s1029_s1 + $0x58] sm:$0xff] (!%p139_p2) }
   0x9   : > { %704 = vmatprep.subr.bf16.mxu0 (!%p139_p2), %v760_v3  ;;  %726 = vmatprep.subr.bf16.mxu1 (!%p139_p2), %v760_v3  ;;  %v714_v16 = vpack.c.bf16 (!%p139_p2), %v210_v15, %v209_v14  ;;  %p163_p3 = scmp.lt.s32.totalorder (!%p139_p2), %s162_s7, 53  ;;  %v717_v19 = vpack.c.bf16 (!%p139_p2), %v212_v18, %v211_v17  ;;  %v213_v20 = vld [vmem:[%s1029_s1 + $0x60] sm:$0xff] (!%p139_p2)  ;;  %v214_v21 = vld [vmem:[%s1029_s1 + $0x68] sm:$0xff] (!%p139_p2)  ;;  %v215_v23 = vld [vmem:[%s1029_s1 + $0x70] sm:$0xff] (!%p139_p2) }
   0xa   : > { %v720_v22 = vpack.c.bf16 (!%p139_p2), %v214_v21, %v213_v20  ;;  %v216_v24 = vld [vmem:[%s1029_s1 + $0x78] sm:$0xff] (!%p139_p2)  ;;  %v935_v53 = vld [vmem:[%s1030_s2] ss:$0 sm:$0xff] (!%p139_p2) }
   0xb   : > { %v723_v25 = vpack.c.bf16 (!%p139_p2), %v216_v24, %v215_v23 }
   0xc   : > { %706 = vmatpush3.bf16.msra.mxu0 (!%p139_p2), %v705_v7  ;;  %734 = vmatpush3.bf16.msra.mxu1 (!%p139_p2), %v705_v7 }
   0xd   : > { %707 = vmatprep.subr.bf16.mxu0 %v760_v3  ;;  %727 = vmatprep.subr.bf16.mxu1 %v760_v3  ;;  %s1033_s7 = smov (!%p163_p3, %s162_s7), 53 }
   0xe   : > { %s540_s21 = sshll.u32 %s1033_s7, 3 }
   0xf   : > { %s853_s24 = scalar_lea.vmem %s1028_s0, %s540_s21  ;;  %s944_s29 = scalar_lea.vmem %s1031_s3, %s540_s21 }
  0x10   : > { %709 = vmatpush3.bf16.msra.mxu0 %v708_v10  ;;  %735 = vmatpush3.bf16.msra.mxu1 %v708_v10  ;;  %v174_v26 = vld [vmem:[%s853_s24] sm:$0xff]  ;;  %v188_v27 = vld [vmem:[%s853_s24 + $0x70] sm:$0xff]  ;;  %v175_v28 = vld [vmem:[%s853_s24 + $0x8] sm:$0xff] }
  0x11   : > { %710 = vmatprep.subr.bf16.mxu0 %v760_v3  ;;  %728 = vmatprep.subr.bf16.mxu1 %v760_v3  ;;  %v189_v29 = vld [vmem:[%s853_s24 + $0x78] sm:$0xff]  ;;  %v176_v30 = vld [vmem:[%s853_s24 + $0x10] sm:$0xff]  ;;  %v190_v31 = vld [vmem:[%s853_s24 + $0x80] sm:$0xff] }
  0x12   : > { %v177_v32 = vld [vmem:[%s853_s24 + $0x18] sm:$0xff]  ;;  %v191_v33 = vld [vmem:[%s853_s24 + $0x88] sm:$0xff]  ;;  %v178_v34 = vld [vmem:[%s853_s24 + $0x20] sm:$0xff] }
  0x13   : > { %v192_v35 = vld [vmem:[%s853_s24 + $0x90] sm:$0xff]  ;;  %v179_v36 = vld [vmem:[%s853_s24 + $0x28] sm:$0xff]  ;;  %v193_v37 = vld [vmem:[%s853_s24 + $0x98] sm:$0xff] }
  0x14   : > { %712 = vmatpush3.bf16.msra.mxu0 %v711_v13  ;;  %736 = vmatpush3.bf16.msra.mxu1 %v711_v13  ;;  %v180_v38 = vld [vmem:[%s853_s24 + $0x30] sm:$0xff]  ;;  %v194_v39 = vld [vmem:[%s853_s24 + $0xa0] sm:$0xff]  ;;  %v181_v40 = vld [vmem:[%s853_s24 + $0x38] sm:$0xff] }
  0x15   : > { %713 = vmatprep.subr.bf16.mxu0 %v760_v3  ;;  %729 = vmatprep.subr.bf16.mxu1 %v760_v3  ;;  %v195_v41 = vld [vmem:[%s853_s24 + $0xa8] sm:$0xff]  ;;  %v182_v42 = vld [vmem:[%s853_s24 + $0x40] sm:$0xff]  ;;  %v196_v43 = vld [vmem:[%s853_s24 + $0xb0] sm:$0xff] }
  0x16   : > { %v183_v44 = vld [vmem:[%s853_s24 + $0x48] sm:$0xff]  ;;  %v197_v45 = vld [vmem:[%s853_s24 + $0xb8] sm:$0xff]  ;;  %v184_v46 = vld [vmem:[%s853_s24 + $0x50] sm:$0xff] }
  0x17   : > { %v198_v47 = vld [vmem:[%s853_s24 + $0xc0] sm:$0xff]  ;;  %v185_v48 = vld [vmem:[%s853_s24 + $0x58] sm:$0xff]  ;;  %v199_v49 = vld [vmem:[%s853_s24 + $0xc8] sm:$0xff] }
  0x18   : > { %715 = vmatpush3.bf16.msra.mxu0 %v714_v16  ;;  %737 = vmatpush3.bf16.msra.mxu1 %v714_v16  ;;  %v186_v50 = vld [vmem:[%s853_s24 + $0x60] sm:$0xff]  ;;  %v200_v51 = vld [vmem:[%s853_s24 + $0xd0] sm:$0xff]  ;;  %v187_v52 = vld [vmem:[%s853_s24 + $0x68] sm:$0xff] }
  0x19   : > { %716 = vmatprep.subr.bf16.mxu0 %v760_v3  ;;  %730 = vmatprep.subr.bf16.mxu1 %v760_v3 }
  0x1c   : > { %718 = vmatpush3.bf16.msra.mxu0 %v717_v19  ;;  %738 = vmatpush3.bf16.msra.mxu1 %v717_v19 }
  0x1d   : > { %719 = vmatprep.subr.bf16.mxu0 %v760_v3  ;;  %731 = vmatprep.subr.bf16.mxu1 %v760_v3 }
  0x20   : > { %721 = vmatpush3.bf16.msra.mxu0 %v720_v22  ;;  %739 = vmatpush3.bf16.msra.mxu1 %v720_v22 }
  0x21   : > { %722 = vmatprep.subr.bf16.mxu0 %v760_v3  ;;  %732 = vmatprep.subr.bf16.mxu1 %v760_v3 }
  0x24   : > { %724 = vmatpush3.bf16.msra.mxu0 %v723_v25  ;;  %740 = vmatpush3.bf16.msra.mxu1 %v723_v25 }
  0x27   : > { %621 = vmatmul.mubr.f32.vlgmr.msra.gmra.mrb[0].mxu0 %v174_v26  ;;  %663 = vmatmul.mubr.f32.vlgmr.msra.gmra.mrb[0].mxu1 %v188_v27 }
  0x28   : > { %623 = vmatprep.mubr.msk.f32.mxu0 %vm761_vm0, %v762_v6  ;;  %665 = vmatprep.mubr.msk.f32.mxu1 %vm761_vm0, %v762_v6 }
  0x2b   : > { %624 = vmatmul.mubr.f32.gmra.mrb[2].mxu0 %v175_v28  ;;  %666 = vmatmul.mubr.f32.gmra.mrb[2].mxu1 %v189_v29 }
  0x2c   : > { %626 = vmatprep.mubr.msk.f32.mxu0 %vm761_vm0, %v762_v6  ;;  %668 = vmatprep.mubr.msk.f32.mxu1 %vm761_vm0, %v762_v6 }
  0x2f   : > { %627 = vmatmul.mubr.f32.gmra.mrb[4].mxu0 %v176_v30  ;;  %669 = vmatmul.mubr.f32.gmra.mrb[4].mxu1 %v190_v31 }
  0x30   : > { %629 = vmatprep.mubr.msk.f32.mxu0 %vm761_vm0, %v762_v6  ;;  %671 = vmatprep.mubr.msk.f32.mxu1 %vm761_vm0, %v762_v6 }
  0x33   : > { %630 = vmatmul.mubr.f32.gmra.mrb[6].mxu0 %v177_v32  ;;  %672 = vmatmul.mubr.f32.gmra.mrb[6].mxu1 %v191_v33 }
  0x34   : > { %632 = vmatprep.mubr.msk.f32.mxu0 %vm761_vm0, %v762_v6  ;;  %674 = vmatprep.mubr.msk.f32.mxu1 %vm761_vm0, %v762_v6 }
  0x37   : > { %633 = vmatmul.mubr.f32.gmra.mrb[8].mxu0 %v178_v34  ;;  %675 = vmatmul.mubr.f32.gmra.mrb[8].mxu1 %v192_v35 }
  0x38   : > { %635 = vmatprep.mubr.msk.f32.mxu0 %vm761_vm0, %v762_v6  ;;  %677 = vmatprep.mubr.msk.f32.mxu1 %vm761_vm0, %v762_v6 }
  0x3b   : > { %636 = vmatmul.mubr.f32.gmra.mrb[10].mxu0 %v179_v36  ;;  %678 = vmatmul.mubr.f32.gmra.mrb[10].mxu1 %v193_v37 }
  0x3c   : > { %638 = vmatprep.mubr.msk.f32.mxu0 %vm761_vm0, %v762_v6  ;;  %680 = vmatprep.mubr.msk.f32.mxu1 %vm761_vm0, %v762_v6 }
  0x3f   : > { %639 = vmatmul.mubr.f32.gmra.mrb[12].mxu0 %v180_v38  ;;  %681 = vmatmul.mubr.f32.gmra.mrb[12].mxu1 %v194_v39 }
  0x40   : > { %641 = vmatprep.mubr.msk.f32.mxu0 %vm761_vm0, %v762_v6  ;;  %683 = vmatprep.mubr.msk.f32.mxu1 %vm761_vm0, %v762_v6 }
  0x43   : > { %642 = vmatmul.mubr.f32.gmra.mrb[14].mxu0 %v181_v40  ;;  %684 = vmatmul.mubr.f32.gmra.mrb[14].mxu1 %v195_v41 }
  0x44   : > { %644 = vmatprep.mubr.msk.f32.mxu0 %vm761_vm0, %v762_v6  ;;  %686 = vmatprep.mubr.msk.f32.mxu1 %vm761_vm0, %v762_v6 }
  0x47   : > { %645 = vmatmul.mubr.f32.gmra.mrb[16].mxu0 %v182_v42  ;;  %687 = vmatmul.mubr.f32.gmra.mrb[16].mxu1 %v196_v43 }
  0x48   : > { %647 = vmatprep.mubr.msk.f32.mxu0 %vm761_vm0, %v762_v6  ;;  %689 = vmatprep.mubr.msk.f32.mxu1 %vm761_vm0, %v762_v6 }
  0x4b   : > { %648 = vmatmul.mubr.f32.gmra.mrb[18].mxu0 %v183_v44  ;;  %690 = vmatmul.mubr.f32.gmra.mrb[18].mxu1 %v197_v45 }
  0x4c   : > { %650 = vmatprep.mubr.msk.f32.mxu0 %vm761_vm0, %v762_v6  ;;  %692 = vmatprep.mubr.msk.f32.mxu1 %vm761_vm0, %v762_v6 }
  0x4f   : > { %651 = vmatmul.mubr.f32.gmra.mrb[20].mxu0 %v184_v46  ;;  %693 = vmatmul.mubr.f32.gmra.mrb[20].mxu1 %v198_v47 }
  0x50   : > { %653 = vmatprep.mubr.msk.f32.mxu0 %vm761_vm0, %v762_v6  ;;  %695 = vmatprep.mubr.msk.f32.mxu1 %vm761_vm0, %v762_v6 }
  0x53   : > { %654 = vmatmul.mubr.f32.gmra.mrb[22].mxu0 %v185_v48  ;;  %696 = vmatmul.mubr.f32.gmra.mrb[22].mxu1 %v199_v49 }
  0x54   : > { %656 = vmatprep.mubr.msk.f32.mxu0 %vm761_vm0, %v762_v6  ;;  %698 = vmatprep.mubr.msk.f32.mxu1 %vm761_vm0, %v762_v6 }
  0x57   : > { %657 = vmatmul.mubr.f32.gmra.mrb[24].mxu0 %v186_v50  ;;  %699 = vmatmul.mubr.f32.gmra.mrb[24].mxu1 %v200_v51 }
  0x58   : > { %659 = vmatprep.mubr.msk.f32.mxu0 %vm761_vm0, %v762_v6 }
  0x5b   : > { %660 = vmatmul.mubr.f32.gmra.mrb[26].mxu0 %v187_v52 }
  0xfa   : > { %v290_v54 = vpop.f32.mrb[0].mxu0  ;;  %v360_v55 = vpop.f32.mrb[0].mxu1 }
  0xfb   : > { %v291_v56 = vadd.f32 %v935_v53, %v290_v54  ;;  %v622_v57 = vpop.f32.mrb[1].mxu0  ;;  %v361_v58 = vadd.f32 %v935_v53, %v360_v55  ;;  %v664_v59 = vpop.f32.mrb[1].mxu1 }
  0xfd   : > { %v424_v60 = vmax.f32 %v291_v56, 0.0  ;;  %v438_v61 = vmax.f32 %v361_v58, 0.0 }
  0xfe   : > { %v295_v62 = vpop.f32.mrb[2].mxu0  ;;  %v365_v63 = vpop.f32.mrb[2].mxu1 }
  0xff   : > { %452 = vst.msk [vmem:[%s944_s29] sm:$0xff] %vm451_vm1, %v424_v60  ;;  %466 = vst.msk [vmem:[%s944_s29 + $0x70] sm:$0xff] %vm451_vm1, %v438_v61  ;;  %v296_v0 = vadd.f32 %v935_v53, %v295_v62  ;;  %v625_v1 = vpop.f32.mrb[3].mxu0  ;;  %v366_v2 = vadd.f32 %v935_v53, %v365_v63  ;;  %v667_v3 = vpop.f32.mrb[3].mxu1 }
 0x101   : > { %v425_v4 = vmax.f32 %v296_v0, 0.0  ;;  %v439_v5 = vmax.f32 %v366_v2, 0.0 }
 0x102   : > { %v300_v6 = vpop.f32.mrb[4].mxu0  ;;  %v370_v7 = vpop.f32.mrb[4].mxu1 }
 0x103   : > { %453 = vst.msk [vmem:[%s944_s29 + $0x8] sm:$0xff] %vm451_vm1, %v425_v4  ;;  %467 = vst.msk [vmem:[%s944_s29 + $0x78] sm:$0xff] %vm451_vm1, %v439_v5  ;;  %v301_v8 = vadd.f32 %v935_v53, %v300_v6  ;;  %v628_v9 = vpop.f32.mrb[5].mxu0  ;;  %v371_v10 = vadd.f32 %v935_v53, %v370_v7  ;;  %v670_v11 = vpop.f32.mrb[5].mxu1 }
 0x105   : > { %v426_v12 = vmax.f32 %v301_v8, 0.0  ;;  %v440_v13 = vmax.f32 %v371_v10, 0.0 }
 0x106   : > { %v305_v14 = vpop.f32.mrb[6].mxu0  ;;  %v375_v15 = vpop.f32.mrb[6].mxu1 }
 0x107   : > { %454 = vst.msk [vmem:[%s944_s29 + $0x10] sm:$0xff] %vm451_vm1, %v426_v12  ;;  %468 = vst.msk [vmem:[%s944_s29 + $0x80] sm:$0xff] %vm451_vm1, %v440_v13  ;;  %v306_v16 = vadd.f32 %v935_v53, %v305_v14  ;;  %v631_v17 = vpop.f32.mrb[7].mxu0  ;;  %v376_v18 = vadd.f32 %v935_v53, %v375_v15  ;;  %v673_v19 = vpop.f32.mrb[7].mxu1 }
 0x109   : > { %v427_v20 = vmax.f32 %v306_v16, 0.0  ;;  %v441_v21 = vmax.f32 %v376_v18, 0.0 }
 0x10a   : > { %v310_v22 = vpop.f32.mrb[8].mxu0  ;;  %v380_v23 = vpop.f32.mrb[8].mxu1 }
 0x10b   : > { %455 = vst.msk [vmem:[%s944_s29 + $0x18] sm:$0xff] %vm451_vm1, %v427_v20  ;;  %469 = vst.msk [vmem:[%s944_s29 + $0x88] sm:$0xff] %vm451_vm1, %v441_v21  ;;  %v311_v24 = vadd.f32 %v935_v53, %v310_v22  ;;  %v634_v25 = vpop.f32.mrb[9].mxu0  ;;  %v381_v26 = vadd.f32 %v935_v53, %v380_v23  ;;  %v676_v27 = vpop.f32.mrb[9].mxu1 }
 0x10d   : > { %v428_v28 = vmax.f32 %v311_v24, 0.0  ;;  %v442_v29 = vmax.f32 %v381_v26, 0.0 }
 0x10e   : > { %v315_v30 = vpop.f32.mrb[10].mxu0  ;;  %v385_v31 = vpop.f32.mrb[10].mxu1 }
 0x10f   : > { %456 = vst.msk [vmem:[%s944_s29 + $0x20] sm:$0xff] %vm451_vm1, %v428_v28  ;;  %470 = vst.msk [vmem:[%s944_s29 + $0x90] sm:$0xff] %vm451_vm1, %v442_v29  ;;  %v316_v32 = vadd.f32 %v935_v53, %v315_v30  ;;  %v637_v33 = vpop.f32.mrb[11].mxu0  ;;  %v386_v34 = vadd.f32 %v935_v53, %v385_v31  ;;  %v679_v35 = vpop.f32.mrb[11].mxu1 }
 0x111   : > { %v429_v36 = vmax.f32 %v316_v32, 0.0  ;;  %v443_v37 = vmax.f32 %v386_v34, 0.0 }
 0x112   : > { %v320_v38 = vpop.f32.mrb[12].mxu0  ;;  %v390_v39 = vpop.f32.mrb[12].mxu1 }
 0x113   : > { %457 = vst.msk [vmem:[%s944_s29 + $0x28] sm:$0xff] %vm451_vm1, %v429_v36  ;;  %471 = vst.msk [vmem:[%s944_s29 + $0x98] sm:$0xff] %vm451_vm1, %v443_v37  ;;  %v321_v40 = vadd.f32 %v935_v53, %v320_v38  ;;  %v640_v41 = vpop.f32.mrb[13].mxu0  ;;  %v391_v42 = vadd.f32 %v935_v53, %v390_v39  ;;  %v682_v43 = vpop.f32.mrb[13].mxu1 }
 0x115   : > { %v430_v44 = vmax.f32 %v321_v40, 0.0  ;;  %v444_v45 = vmax.f32 %v391_v42, 0.0 }
 0x116   : > { %v325_v46 = vpop.f32.mrb[14].mxu0  ;;  %v395_v47 = vpop.f32.mrb[14].mxu1 }
 0x117   : > { %458 = vst.msk [vmem:[%s944_s29 + $0x30] sm:$0xff] %vm451_vm1, %v430_v44  ;;  %472 = vst.msk [vmem:[%s944_s29 + $0xa0] sm:$0xff] %vm451_vm1, %v444_v45  ;;  %v326_v48 = vadd.f32 %v935_v53, %v325_v46  ;;  %v643_v49 = vpop.f32.mrb[15].mxu0  ;;  %v396_v50 = vadd.f32 %v935_v53, %v395_v47  ;;  %v685_v51 = vpop.f32.mrb[15].mxu1 }
 0x119   : > { %v431_v52 = vmax.f32 %v326_v48, 0.0  ;;  %v445_v54 = vmax.f32 %v396_v50, 0.0 }
 0x11a   : > { %v330_v55 = vpop.f32.mrb[16].mxu0  ;;  %v400_v56 = vpop.f32.mrb[16].mxu1 }
 0x11b   : > { %459 = vst.msk [vmem:[%s944_s29 + $0x38] sm:$0xff] %vm451_vm1, %v431_v52  ;;  %473 = vst.msk [vmem:[%s944_s29 + $0xa8] sm:$0xff] %vm451_vm1, %v445_v54  ;;  %v331_v57 = vadd.f32 %v935_v53, %v330_v55  ;;  %v646_v58 = vpop.f32.mrb[17].mxu0  ;;  %v401_v59 = vadd.f32 %v935_v53, %v400_v56  ;;  %v688_v60 = vpop.f32.mrb[17].mxu1 }
 0x11d   : > { %v432_v61 = vmax.f32 %v331_v57, 0.0  ;;  %v446_v62 = vmax.f32 %v401_v59, 0.0 }
 0x11e   : > { %v335_v63 = vpop.f32.mrb[18].mxu0  ;;  %v405_v0 = vpop.f32.mrb[18].mxu1 }
 0x11f   : > { %460 = vst.msk [vmem:[%s944_s29 + $0x40] sm:$0xff] %vm451_vm1, %v432_v61  ;;  %474 = vst.msk [vmem:[%s944_s29 + $0xb0] sm:$0xff] %vm451_vm1, %v446_v62  ;;  %v336_v1 = vadd.f32 %v935_v53, %v335_v63  ;;  %v649_v2 = vpop.f32.mrb[19].mxu0  ;;  %v406_v3 = vadd.f32 %v935_v53, %v405_v0  ;;  %v691_v4 = vpop.f32.mrb[19].mxu1 }
 0x121   : > { %v433_v5 = vmax.f32 %v336_v1, 0.0  ;;  %v447_v6 = vmax.f32 %v406_v3, 0.0 }
 0x122   : > { %v340_v7 = vpop.f32.mrb[20].mxu0  ;;  %v410_v8 = vpop.f32.mrb[20].mxu1 }
 0x123   : > { %461 = vst.msk [vmem:[%s944_s29 + $0x48] sm:$0xff] %vm451_vm1, %v433_v5  ;;  %475 = vst.msk [vmem:[%s944_s29 + $0xb8] sm:$0xff] %vm451_vm1, %v447_v6  ;;  %v341_v9 = vadd.f32 %v935_v53, %v340_v7  ;;  %v652_v10 = vpop.f32.mrb[21].mxu0  ;;  %v411_v11 = vadd.f32 %v935_v53, %v410_v8  ;;  %v694_v12 = vpop.f32.mrb[21].mxu1 }
 0x125   : > { %v434_v13 = vmax.f32 %v341_v9, 0.0  ;;  %v448_v14 = vmax.f32 %v411_v11, 0.0 }
 0x126   : > { %v345_v15 = vpop.f32.mrb[22].mxu0  ;;  %v415_v16 = vpop.f32.mrb[22].mxu1 }
 0x127   : > { %462 = vst.msk [vmem:[%s944_s29 + $0x50] sm:$0xff] %vm451_vm1, %v434_v13  ;;  %476 = vst.msk [vmem:[%s944_s29 + $0xc0] sm:$0xff] %vm451_vm1, %v448_v14  ;;  %v346_v17 = vadd.f32 %v935_v53, %v345_v15  ;;  %v655_v18 = vpop.f32.mrb[23].mxu0  ;;  %v416_v19 = vadd.f32 %v935_v53, %v415_v16  ;;  %v697_v20 = vpop.f32.mrb[23].mxu1 }
 0x129   : > { %v435_v21 = vmax.f32 %v346_v17, 0.0  ;;  %v449_v22 = vmax.f32 %v416_v19, 0.0 }
 0x12a   : > { %v350_v23 = vpop.f32.mrb[24].mxu0  ;;  %v420_v24 = vpop.f32.mrb[24].mxu1 }
 0x12b   : > { %463 = vst.msk [vmem:[%s944_s29 + $0x58] sm:$0xff] %vm451_vm1, %v435_v21  ;;  %477 = vst.msk [vmem:[%s944_s29 + $0xc8] sm:$0xff] %vm451_vm1, %v449_v22  ;;  %v351_v25 = vadd.f32 %v935_v53, %v350_v23  ;;  %v658_v26 = vpop.f32.mrb[25].mxu0  ;;  %v421_v27 = vadd.f32 %v935_v53, %v420_v24  ;;  %v700_v28 = vpop.f32.mrb[25].mxu1 }
 0x12d   : > { %v436_v29 = vmax.f32 %v351_v25, 0.0  ;;  %v450_v30 = vmax.f32 %v421_v27, 0.0 }
 0x12e   : > { %v355_v31 = vpop.f32.mrb[26].mxu0 }
 0x12f   : > { %464 = vst.msk [vmem:[%s944_s29 + $0x60] sm:$0xff] %vm451_vm1, %v436_v29  ;;  %478 = vst.msk [vmem:[%s944_s29 + $0xd0] sm:$0xff] %vm451_vm1, %v450_v30  ;;  %v356_v32 = vadd.f32 %v935_v53, %v355_v31  ;;  %v661_v33 = vpop.f32.mrb[27].mxu0 }
 0x131   : > { %v437_v34 = vmax.f32 %v356_v32, 0.0 }
 0x133   : > { %465 = vst.msk [vmem:[%s944_s29 + $0x68] sm:$0xff] %vm451_vm1, %v437_v34 }
 0x134 PF: > { %s13_s12 = sadd.s32 1, %s758_s12  }
 0x135   : > { %p10_p4 = scmp.ge.s32.totalorder %s13_s12, 4  }
 0x137   :  { %12 = sbr.rel (!%p10_p4) target bundleno = 1 (0x1), region = 62 }

</bundles_post_ra>
